<compile_context>
chip_gen: v7x
topology: tpu7x:2x2x1
jax: 0.10.0
libtpu: 0.0.40
codegen_flags: <defaults>
</compile_context>

<pallas_src>
import jax
import jax.numpy as jnp
from jax.experimental import pallas as pl
from jax.experimental.pallas import tpu as pltpu


def _round_up(n, m):
    return ((n + m - 1) // m) * m


def _fused_ensemble_kernel(x_ref, w1_ref, b1_ref, w2_ref, b2_ref, o_ref):
    # h_cat = relu(x @ W1_packed + b1_packed)  -> (TB, E*H) lane-dense
    h = jnp.dot(x_ref[...], w1_ref[...], preferred_element_type=jnp.float32)
    h = jnp.maximum(h + b1_ref[...], 0.0)
    # Second matmul: row-stacked (1/E)*W2 performs the ensemble reduction.
    y = jnp.dot(h.astype(w2_ref.dtype), w2_ref[...],
                preferred_element_type=jnp.float32)
    o_ref[...] = (y + b2_ref[...]).astype(o_ref.dtype)


def ensemble_forward(x, w1, b1, w2, b2, *, compute_dtype=jnp.bfloat16):
    """Averaged ensemble of Linear->ReLU->Linear estimators.

    x:  (B, D_in)
    w1: (E, D_in, H),  b1: (E, 1, H)
    w2: (E, H, D_out), b2: (E, 1, D_out)
    returns (B, D_out) float32: mean_e( relu(x @ W1_e + b1_e) @ W2_e + b2_e ).
    """
    E, D_in, H = w1.shape
    _, _, D_out = w2.shape
    B = x.shape[0]

    # ---- host-side packing (layout plumbing, done once per weight set) ----
    HL = E * H
    HL_pad = _round_up(HL, 128)      # lane-dense hidden width
    DO_pad = _round_up(D_out, 128)   # lane-dense (unmasked) output stores
    B_pad = _round_up(B, 8)          # sublane alignment

    # W1 packed along lanes: (D_in, E*H);   h_cat[:, e*H+h] = estimator-e hidden
    w1_p = jnp.transpose(w1, (1, 0, 2)).reshape(D_in, HL)
    b1_p = b1.reshape(1, HL)
    # W2 row-stacked: (E*H, D_out);  h_cat @ w2_s == sum_e h_e @ W2_e.
    # Fold the 1/E ensemble average into W2 and b2 (no per-call scale).
    w2_s = (w2.astype(jnp.float32) / E).reshape(HL, D_out)
    b2_m = jnp.mean(b2.astype(jnp.float32), axis=0).reshape(1, D_out)

    # Zero-pad to lane/sublane-aligned shapes (padding is mathematically inert).
    w1_p = jnp.pad(w1_p, ((0, 0), (0, HL_pad - HL)))
    b1_p = jnp.pad(b1_p, ((0, 0), (0, HL_pad - HL)))
    w2_s = jnp.pad(w2_s, ((0, HL_pad - HL), (0, DO_pad - D_out)))
    b2_m = jnp.pad(b2_m, ((0, 0), (0, DO_pad - D_out)))
    x_p = jnp.pad(x, ((0, B_pad - B), (0, 0)))

    # bf16 matmul operands, f32 accumulation / biases / output.
    x_p = x_p.astype(compute_dtype)
    w1_p = w1_p.astype(compute_dtype)
    w2_s = w2_s.astype(compute_dtype)
    b1_p = b1_p.astype(jnp.float32)
    b2_m = b2_m.astype(jnp.float32)

    # Batch tiling: one block at small B; shard big batches across TCs (v7x).
    if B_pad >= 512 and B_pad % 256 == 0:
        tb = 256
    else:
        tb = B_pad
    grid = (B_pad // tb,)

    # TODO(synk): for very large E*H / D_in (weights exceeding the scoped VMEM
    # budget, esp. v7x's 64 MiB), add a K-tiling grid axis with an f32 VMEM
    # accumulator instead of loading full weight slabs.
    grid_spec = pltpu.PrefetchScalarGridSpec(
        num_scalar_prefetch=0,
        grid=grid,
        in_specs=[
            pl.BlockSpec((tb, D_in), lambda i: (i, 0)),        # x tile
            pl.BlockSpec((D_in, HL_pad), lambda i: (0, 0)),    # packed W1
            pl.BlockSpec((1, HL_pad), lambda i: (0, 0)),       # packed b1
            pl.BlockSpec((HL_pad, DO_pad), lambda i: (0, 0)),  # stacked W2 / E
            pl.BlockSpec((1, DO_pad), lambda i: (0, 0)),       # mean b2
        ],
        out_specs=pl.BlockSpec((tb, DO_pad), lambda i: (i, 0)),
    )

    out = pl.pallas_call(
        _fused_ensemble_kernel,
        out_shape=jax.ShapeDtypeStruct((B_pad, DO_pad), jnp.float32),
        grid_spec=grid_spec,
        compiler_params=pltpu.CompilerParams(
            dimension_semantics=("parallel",),   # batch axis -> both TCs on v7x
        ),
    )(x_p, w1_p, b1_p, w2_s, b2_m)

    return out[:B, :D_out]


def reference_forward(x, w1, b1, w2, b2):
    h = jnp.maximum(jnp.einsum("bd,edh->ebh", x, w1) + b1, 0.0)
    y = jnp.einsum("ebh,eho->ebo", h, w2) + b2
    return jnp.mean(y, axis=0)


if __name__ == "__main__":
    key = jax.random.PRNGKey(0)
    B, D_in, H, D_out, n_estimators = 8, 32, 64, 16, 4

    k = jax.random.split(key, 5)
    x = jax.random.normal(k[0], (B, D_in), dtype=jnp.float32)
    # Deterministic per-estimator parameter init (synthetic, no checkpoint load).
    w1 = jax.random.normal(k[1], (n_estimators, D_in, H), dtype=jnp.float32) * 0.1
    b1 = jax.random.normal(k[2], (n_estimators, 1, H), dtype=jnp.float32) * 0.05
    w2 = jax.random.normal(k[3], (n_estimators, H, D_out), dtype=jnp.float32) * 0.1
    b2 = jax.random.normal(k[4], (n_estimators, 1, D_out), dtype=jnp.float32) * 0.05

    out = jax.block_until_ready(ensemble_forward(x, w1, b1, w2, b2))

    ref_f32 = reference_forward(x, w1, b1, w2, b2)
    assert out.shape == (B, D_out)
    # bf16 matmul operands + f32 accumulation vs pure-f32 reference.
    assert jnp.allclose(out, ref_f32, atol=1e-2, rtol=1e-2), "mismatch vs reference"

    print("KERNEL_OK")
</pallas_src>

<mosaic_0001>
module attributes {stable_mosaic.version = 11 : i64} {
  func.func @_fused_ensemble_kernel(%arg0: i32, %arg1: memref<8x32xbf16, #tpu.memory_space<vmem>>, %arg2: memref<32x256xbf16, #tpu.memory_space<vmem>>, %arg3: memref<1x256xf32, #tpu.memory_space<vmem>>, %arg4: memref<256x128xbf16, #tpu.memory_space<vmem>>, %arg5: memref<1x128xf32, #tpu.memory_space<vmem>>, %arg6: memref<8x128xf32, #tpu.memory_space<vmem>>) attributes {dimension_semantics = [#tpu.dimension_semantics<parallel>], iteration_bounds = array<i64: 1>, scalar_prefetch = 0 : i64, scratch_operands = 0 : i64, tpu.core_type = #tpu.core_type<tc>, window_params = [{transform_indices = @transform_0, window_bounds = array<i64: 8, 32>}, {pipeline_mode = #tpu.pipeline_mode<synchronous>, transform_indices = @transform_1, window_bounds = array<i64: 32, 256>}, {pipeline_mode = #tpu.pipeline_mode<synchronous>, transform_indices = @transform_2, window_bounds = array<i64: 1, 256>}, {pipeline_mode = #tpu.pipeline_mode<synchronous>, transform_indices = @transform_3, window_bounds = array<i64: 256, 128>}, {pipeline_mode = #tpu.pipeline_mode<synchronous>, transform_indices = @transform_4, window_bounds = array<i64: 1, 128>}, {transform_indices = @transform_5, window_bounds = array<i64: 8, 128>}]} {
    %c0 = arith.constant 0 : index
    %c0_0 = arith.constant 0 : index
    %0 = vector.load %arg1[%c0, %c0_0] : memref<8x32xbf16, #tpu.memory_space<vmem>>, vector<8x32xbf16>
    %c0_1 = arith.constant 0 : index
    %c0_2 = arith.constant 0 : index
    %1 = vector.load %arg2[%c0_1, %c0_2] : memref<32x256xbf16, #tpu.memory_space<vmem>>, vector<32x256xbf16>
    %cst = arith.constant dense<0.000000e+00> : vector<8x256xf32>
    %2 = tpu.matmul %0, %1, %cst {dimension_numbers = #tpu.dot_dimension_numbers<[1], [0], [0], [1], [0, 0, 1, 1], [], []>} : vector<8x32xbf16>, vector<32x256xbf16>, vector<8x256xf32> -> vector<8x256xf32>
    %c0_3 = arith.constant 0 : index
    %c0_4 = arith.constant 0 : index
    %3 = vector.load %arg3[%c0_3, %c0_4] : memref<1x256xf32, #tpu.memory_space<vmem>>, vector<1x256xf32>
    %4 = vector.broadcast %3 : vector<1x256xf32> to vector<8x256xf32>
    %5 = arith.addf %2, %4 : vector<8x256xf32>
    %cst_5 = arith.constant 0.000000e+00 : f32
    %6 = vector.broadcast %cst_5 : f32 to vector<8x256xf32>
    %7 = arith.maximumf %5, %6 : vector<8x256xf32>
    %8 = arith.truncf %7 : vector<8x256xf32> to vector<8x256xbf16>
    %c0_6 = arith.constant 0 : index
    %c0_7 = arith.constant 0 : index
    %9 = vector.load %arg4[%c0_6, %c0_7] : memref<256x128xbf16, #tpu.memory_space<vmem>>, vector<256x128xbf16>
    %cst_8 = arith.constant dense<0.000000e+00> : vector<8x128xf32>
    %10 = tpu.matmul %8, %9, %cst_8 {dimension_numbers = #tpu.dot_dimension_numbers<[1], [0], [0], [1], [0, 0, 1, 1], [], []>} : vector<8x256xbf16>, vector<256x128xbf16>, vector<8x128xf32> -> vector<8x128xf32>
    %c0_9 = arith.constant 0 : index
    %c0_10 = arith.constant 0 : index
    %11 = vector.load %arg5[%c0_9, %c0_10] : memref<1x128xf32, #tpu.memory_space<vmem>>, vector<1x128xf32>
    %12 = vector.broadcast %11 : vector<1x128xf32> to vector<8x128xf32>
    %13 = arith.addf %10, %12 : vector<8x128xf32>
    %c0_11 = arith.constant 0 : index
    %c0_12 = arith.constant 0 : index
    %14 = vector.load %arg6[%c0_11, %c0_12] : memref<8x128xf32, #tpu.memory_space<vmem>>, vector<8x128xf32>
    tpu.vector_store %arg6[%c0_11, %c0_12], %13 {strides = array<i32>} : memref<8x128xf32, #tpu.memory_space<vmem>>, vector<8x128xf32>,
    return
  }
  func.func @transform_0(%arg0: i32) -> (i32, i32) {
    %c0_i32 = arith.constant 0 : i32
    %c0_i32_0 = arith.constant 0 : i32
    return %arg0, %c0_i32 : i32, i32
  }
  func.func @transform_1(%arg0: i32) -> (i32, i32) {
    %c0_i32 = arith.constant 0 : i32
    %c0_i32_0 = arith.constant 0 : i32
    %c0_i32_1 = arith.constant 0 : i32
    return %c0_i32, %c0_i32_0 : i32, i32
  }
  func.func @transform_2(%arg0: i32) -> (i32, i32) {
    %c0_i32 = arith.constant 0 : i32
    %c0_i32_0 = arith.constant 0 : i32
    %c0_i32_1 = arith.constant 0 : i32
    return %c0_i32, %c0_i32_0 : i32, i32
  }
  func.func @transform_3(%arg0: i32) -> (i32, i32) {
    %c0_i32 = arith.constant 0 : i32
    %c0_i32_0 = arith.constant 0 : i32
    %c0_i32_1 = arith.constant 0 : i32
    return %c0_i32, %c0_i32_0 : i32, i32
  }
  func.func @transform_4(%arg0: i32) -> (i32, i32) {
    %c0_i32 = arith.constant 0 : i32
    %c0_i32_0 = arith.constant 0 : i32
    %c0_i32_1 = arith.constant 0 : i32
    return %c0_i32, %c0_i32_0 : i32, i32
  }
  func.func @transform_5(%arg0: i32) -> (i32, i32) {
    %c0_i32 = arith.constant 0 : i32
    %c0_i32_0 = arith.constant 0 : i32
    return %arg0, %c0_i32 : i32, i32
  }
}

</mosaic_0001>

<bundles_post_ra>
// kernel: tpu_custom_call.1
= control target key start
LH: loop header
LB: loop body
LE: loop exit
PB: predicated region body
PF: predicated region fallthrough
CT: control target
= control target key end

     0   :  { %10 = vsyncpa [#allocation3], 0  ;;  %s601_s0 = inlined_call_operand.hbm [shape: bf16[8,32], index: 0, kind: input, shape index: {}]   ;;  %s602_s1 = inlined_call_operand.hbm [shape: bf16[32,256], index: 1, kind: input, shape index: {}]   ;;  %s603_s2 = inlined_call_operand.vmem [shape: f32[1,256], index: 2, kind: input, shape index: {}]   ;;  %s604_s3 = inlined_call_operand.hbm [shape: bf16[256,128], index: 3, kind: input, shape index: {}]   ;;  %s605_s4 = inlined_call_operand.vmem [shape: f32[1,128], index: 4, kind: input, shape index: {}]   ;;  %s606_s5 = inlined_call_operand.hbm [shape: f32[8,128], index: 5, kind: output, shape index: {}]  }
   0x1   :  { %11 = vsyncpa [#allocation6], 0 }
   0x2   :  { %12 = vsyncpa [#allocation4], 0  ;;  %s508_s18 = smov [#allocation5]   ;;  %s414_s22 = scalar_lea.hbm %s602_s1, 512 }
   0x3   :  { %s28_s19 = sshll.u32 %s508_s18, 4  ;;  %p415_p0 = scmp.ne.s32.totalorder %s602_s1, %s414_s22  ;;  %s29_s19 = int_to_ptr.vmem [resolvable:$true] %s28_s19 }
   0x4   :  { %p418_p1 = scmp.lt.u32.totalorder %s414_s22, %s602_s1 }
   0x6   :  { %p420_p2 = pnand %p418_p1, %p415_p0 }
   0x8   :  { %423 = shalt.err (!%p420_p2)
}
   0x9   :  { %s424_s27 = scalar_lea.vmem %s29_s19, 512  ;;  %p429_p4 = scmp.lt.s32.totalorder %s29_s19, %s29_s19 }
   0xa   :  { %p425_p3 = scmp.ne.s32.totalorder %s29_s19, %s424_s27  ;;  %p430_p5 = scmp.lt.s32.totalorder %s424_s27, %s424_s27 }
   0xc   :  { %p431_p6 = por %p430_p5, %p429_p4 }
   0xe   :  { %p432_p7 = pnand %p431_p6, %p425_p3 }
  0x10   :  { %435 = shalt.err (!%p432_p7)
}
  0x11   :  { %s509_s28 = smov 128   ;;  %s510_s29 = smov 8  }
  0x12   :  { %34 = dma.hbm_to_vmem [thread:$0]  %s602_s1, 512, %s29_s19, [#allocation6], %s509_s28, %s509_s28, %s510_s29  }
  0x13   :  { %s511_s7 = smov [#allocation2]   ;;  %s512_s9 = smov [#allocation7]  }
  0x14   :  { %s19_s8 = sshll.u32 %s511_s7, 4  ;;  %s42_s10 = sshll.u32 %s512_s9, 4  ;;  %s20_s8 = int_to_ptr.vmem [resolvable:$true] %s19_s8  ;;  %s43_s10 = int_to_ptr.vmem [resolvable:$true] %s42_s10 }
  0x15   :  { %s436_s13 = scalar_lea.hbm %s601_s0, 64 }
  0x16   :  { %p437_p8 = scmp.ne.s32.totalorder %s601_s0, %s436_s13  ;;  %p440_p9 = scmp.lt.u32.totalorder %s436_s13, %s601_s0 }
  0x18   :  { %p442_p10 = pnand %p440_p9, %p437_p8 }
  0x1a   :  { %445 = shalt.err (!%p442_p10)
}
  0x1b   :  { %s446_s1 = scalar_lea.vmem %s20_s8, 64  ;;  %p451_p12 = scmp.lt.s32.totalorder %s20_s8, %s20_s8 }
  0x1c   :  { %p447_p11 = scmp.ne.s32.totalorder %s20_s8, %s446_s1  ;;  %p452_p13 = scmp.lt.s32.totalorder %s446_s1, %s446_s1 }
  0x1e   :  { %p453_p0 = por %p452_p13, %p451_p12 }
  0x20   :  { %p454_p1 = pnand %p453_p0, %p447_p11 }
  0x22   :  { %457 = shalt.err (!%p454_p1)
}
  0x23   :  { %22 = dma.hbm_to_vmem [thread:$0]  %s601_s0, 64, %s20_s8, [#allocation3]  }
  0x24   :  { %s458_s22 = scalar_lea.hbm %s604_s3, 2048 }
  0x25   :  { %p459_p2 = scmp.ne.s32.totalorder %s604_s3, %s458_s22  ;;  %p462_p3 = scmp.lt.u32.totalorder %s458_s22, %s604_s3 }
  0x27   :  { %p464_p4 = pnand %p462_p3, %p459_p2 }
  0x29   :  { %467 = shalt.err (!%p464_p4)
}
  0x2a   :  { %s468_s27 = scalar_lea.vmem %s43_s10, 2048  ;;  %p473_p6 = scmp.lt.s32.totalorder %s43_s10, %s43_s10 }
  0x2b   :  { %p469_p5 = scmp.ne.s32.totalorder %s43_s10, %s468_s27  ;;  %p474_p7 = scmp.lt.s32.totalorder %s468_s27, %s468_s27 }
  0x2d   :  { %p475_p8 = por %p474_p7, %p473_p6 }
  0x2f   :  { %p476_p9 = pnand %p475_p8, %p469_p5 }
  0x31   :  { %479 = shalt.err (!%p476_p9)
}
  0x32   :  { %s513_s0 = smov 64   ;;  %s514_s28 = smov 4  }
  0x33   :  { %48 = dma.hbm_to_vmem [thread:$0]  %s604_s3, 2048, %s43_s10, [#allocation6], %s513_s0, %s513_s0, %s514_s28  }
  0x34   :  { %502 = dma.done.wait [#allocation3], 64  }
  0x35   :  { %503 = vsyncadd [#allocation3], 4294967232 }
  0x36   :  { %504 = dma.done.wait [#allocation6], 2560  }
  0x37   :  { %505 = vsyncadd [#allocation6], 4294964736  ;;  %v515_v0 = vmov 0   ;;  %v392_v1 = vld [vmem:[#allocation5 + $0x4] ss:$8 sps:$4 sm:$0xff]   ;;  %vm98_vm0 = vcmask 261120   ;;  %v68_v22 = vlaneseq }
  0x38   :  { %134 = vmatprep.mubr.bf16.mxu0 %v515_v0  ;;  %v394_v2 = vld [vmem:[#allocation5] ss:$8 sps:$4 sm:$0xff]   ;;  %102 = vmatprep.subr.bf16.mxu0 %v392_v1  ;;  %v395_v3 = vld [vmem:[#allocation5 + $0x14] ss:$8 sps:$4 sm:$0xff]   ;;  %v397_v4 = vld [vmem:[#allocation5 + $0x10] ss:$8 sps:$4 sm:$0xff]  }
  0x39   :  { %103 = vmatpush1.bf16.msra.mxu0 %v394_v2  ;;  %v398_v5 = vld [vmem:[#allocation7 + $0x40] sm:$0xff]   ;;  %v61_v7 = vld [vmem:[#allocation2] sm:$0xf]  ;;  %v400_v8 = vld [vmem:[#allocation7 + $0x48] sm:$0xff]   ;;  %v69_v23 = vshrl.u32 %v68_v22, 7 }
  0x3a   :  { %104 = vmatprep.subr.bf16.mxu0 %v395_v3  ;;  %v399_v6 = vld [vmem:[#allocation7] sm:$0xff]   ;;  %361 = vmatprep.subr.bf16.mxu1 %v398_v5  ;;  %v401_v9 = vld [vmem:[#allocation7 + $0x8] sm:$0xff]   ;;  %v402_v10 = vld [vmem:[#allocation7 + $0x50] sm:$0xff]  }
  0x3b   :  { %362 = vmatpush3.bf16.msra.mxu1 %v399_v6  ;;  %v403_v11 = vld [vmem:[#allocation7 + $0x10] sm:$0xff]   ;;  %v404_v12 = vld [vmem:[#allocation7 + $0x58] sm:$0xff]   ;;  %v406_v14 = vld [vmem:[#allocation7 + $0x60] sm:$0xff]   ;;  %v70_v24 = vsub.s32 0, %v69_v23  ;;  %v74_v26 = vsub.s32 1, %v69_v23 }
  0x3c   :  { %363 = vmatprep.subr.bf16.mxu1 %v400_v8  ;;  %v405_v13 = vld [vmem:[#allocation7 + $0x18] sm:$0xff]   ;;  %v407_v15 = vld [vmem:[#allocation7 + $0x20] sm:$0xff]   ;;  %v408_v16 = vld [vmem:[#allocation7 + $0x68] sm:$0xff]  }
  0x3d   :  { %105 = vmatpush1.bf16.msra.mxu0 %v397_v4  ;;  %v409_v17 = vld [vmem:[#allocation7 + $0x28] sm:$0xff]   ;;  %v410_v18 = vld [vmem:[#allocation7 + $0x70] sm:$0xff]   ;;  %v412_v20 = vld [vmem:[#allocation7 + $0x78] sm:$0xff]  }
  0x3e   :  { %v411_v19 = vld [vmem:[#allocation7 + $0x30] sm:$0xff]   ;;  %v413_v21 = vld [vmem:[#allocation7 + $0x38] sm:$0xff]  }
  0x3f   :  { %364 = vmatpush3.bf16.msra.mxu1 %v401_v9  ;;  %v66_v25 = vld [vmem:[%s603_s2] sm:$0x3]  ;;  %s516_s2 = smov [#allocation8]  }
  0x40   :  { %343 = vmatmul.mubr.msk.bf16.vlgmr.msra.gmra.mrb[0].mxu0 %vm98_vm0, %v61_v7  ;;  %365 = vmatprep.subr.bf16.mxu1 %v402_v10  ;;  %v71_v27 = vrot.slane %v66_v25, %v70_v24  ;;  %v75_v28 = vrot.slane %v66_v25, %v74_v26  ;;  %v344_v40 = vld [vmem:[%s605_s4] ss:$0 sm:$0xff]  ;;  %s329_s9 = sshll.u32 %s516_s2, 4  ;;  %s330_s9 = int_to_ptr.vmem [resolvable:$true] %s329_s9 }
  0x41   :  { %s480_s10 = scalar_lea.vmem %s330_s9, 128  ;;  %p485_p11 = scmp.lt.s32.totalorder %s330_s9, %s330_s9 }
  0x42   :  { %p481_p10 = scmp.ne.s32.totalorder %s330_s9, %s480_s10  ;;  %p486_p12 = scmp.lt.s32.totalorder %s480_s10, %s480_s10 }
  0x43   :  { %366 = vmatpush3.bf16.msra.mxu1 %v403_v11 }
  0x44   :  { %367 = vmatprep.subr.bf16.mxu1 %v404_v12  ;;  %p487_p13 = por %p486_p12, %p485_p11 }
  0x46   :  { %p488_p0 = pnand %p487_p13, %p481_p10 }
  0x47   :  { %368 = vmatpush3.bf16.msra.mxu1 %v405_v13 }
  0x48   :  { %369 = vmatprep.subr.bf16.mxu1 %v406_v14 }
  0x4b   :  { %370 = vmatpush3.bf16.msra.mxu1 %v407_v15 }
  0x4c   :  { %371 = vmatprep.subr.bf16.mxu1 %v408_v16 }
  0x4f   :  { %372 = vmatpush3.bf16.msra.mxu1 %v409_v17 }
  0x50   :  { %373 = vmatprep.subr.bf16.mxu1 %v410_v18 }
  0x53   :  { %374 = vmatpush3.bf16.msra.mxu1 %v411_v19 }
  0x54   :  { %375 = vmatprep.subr.bf16.mxu1 %v412_v20 }
  0x57   :  { %376 = vmatpush3.bf16.msra.mxu1 %v413_v21 }
 0x113   :  { %v136_v29 = vpop.f32.mrb[0].mxu0 }
 0x114   :  { %v137_v30 = vadd.f32 %v136_v29, %v71_v27  ;;  %v138_v31 = vpop.f32.mrb[1].mxu0 }
 0x115   :  { %v139_v32 = vadd.f32 %v138_v31, %v75_v28  ;;  %v140_v33 = vpop.f32.mrb[2].mxu0 }
 0x116   :  { %v143_v34 = vmax.f32 %v137_v30, 0.0  ;;  %v141_v35 = vpop.f32.mrb[3].mxu0 }
 0x117   :  { %v144_v36 = vmax.f32 %v139_v32, 0.0 }
 0x118   :  { %v145_v38 = vpack.c.bf16 %v143_v34, %v143_v34 }
 0x119   :  { %v146_v37 = vpack.c.bf16 %v144_v36, %v144_v36 }
 0x11b   :  { %314 = vmatprep.mubr.bf16.mxu1 %v146_v37 }
 0x11c   :  { %315 = vmatmul.mubr.bf16.vlgmr.msra.gmra.mrb[0].mxu1 %v145_v38 }
 0x1ef   :  { %v377_v39 = vpop.f32.mrb[0].mxu1 }
 0x1f0   :  { %v378_v41 = vpop.f32.mrb[1].mxu1 }
 0x1f1   :  { %v379_v42 = vadd.f32 %v378_v41, %v377_v39  ;;  %v380_v43 = vpop.f32.mrb[2].mxu1 }
 0x1f2   :  { %v381_v44 = vpop.f32.mrb[3].mxu1 }
 0x1f3   :  { %v317_v45 = vadd.f32 %v379_v42, %v344_v40 }
 0x1f5   :  { %322 = vst [vmem:[#allocation8] sm:$0xff] %v317_v45 }
 0x1f6   :  { %491 = shalt.err (!%p488_p0)
}
 0x1f7   :  { %s492_s4 = scalar_lea.hbm %s606_s5, 128 }
 0x1f8   :  { %p493_p1 = scmp.ne.s32.totalorder %s606_s5, %s492_s4  ;;  %p496_p2 = scmp.lt.u32.totalorder %s492_s4, %s606_s5 }
 0x1fa   :  { %p498_p3 = pnand %p496_p2, %p493_p1 }
 0x1fc   :  { %501 = shalt.err (!%p498_p3)
}
 0x1fd   :  { %332 = dma.vmem_to_hbm [thread:$0]  %s330_s9, 128, %s606_s5, [#allocation4]  }
 0x1fe   :  { %506 = dma.done.wait [#allocation4], 128  }
 0x1ff   :  { %507 = vsyncadd [#allocation4], 4294967168 }
 0x200   :  { %336 = vsyncpa [#allocation3], 1 }
 0x201   :  { %337 = vsyncpa [#allocation6], 1 }
 0x202   :  { %338 = vsyncpa [#allocation4], 1 }

</bundles_post_ra>
